<compile_context>
chip_gen: v7x
topology: tpu7x:2x2x1
jax: 0.10.0
libtpu: 0.0.40
codegen_flags: <defaults>
</compile_context>

<pallas_src>
import numpy as np
import jax
import jax.numpy as jnp
from jax.experimental import pallas as pl
from jax.experimental.pallas import tpu as pltpu


# ----------------------------------------------------------------------------- helpers --

def _adaptive_pool_matrix(size: int, out: int = 4) -> np.ndarray:
    """P such that x(len=size) @ P == AdaptiveAvgPool1d(out)(x) (exact torch bins)."""
    P = np.zeros((size, out), dtype=np.float32)
    for i in range(out):
        s = (i * size) // out
        e = -(-((i + 1) * size) // out)  # ceil
        P[s:e, i] = 1.0 / (e - s)
    return P


_SUBLANE = {4: 8, 2: 16, 1: 32}   # dtype itemsize -> sublane packing (f32 / bf16 / int8-fp8)


def _pad_to(x: int, m: int) -> int:
    return -(-x // m) * m


def _padded_vmem_bytes(shape, itemsize: int) -> int:
    """Approximate VMEM footprint of ONE buffer of `shape` after (sublane, 128) padding."""
    shape = tuple(shape)
    if len(shape) == 1:
        shape = (1,) + shape
    lead = 1
    for d in shape[:-2]:
        lead *= int(d)
    sub = _SUBLANE.get(itemsize, 8)
    return lead * _pad_to(int(shape[-2]), sub) * _pad_to(int(shape[-1]), 128) * itemsize


def _vmem_budget_bytes() -> int:
    """Scoped-VMEM limit to request: a safe fraction of this chip's physical per-core VMEM."""
    try:
        phys = int(pltpu.get_tpu_info().vmem_capacity_bytes)
    except Exception:
        phys = 64 << 20            # conservative default: v7x per-core VMEM
    return min((phys * 3) // 4, 100 << 20)


def _pick_channel_block(c_out: int, lanes: int, itemsize: int, avail_bytes: int) -> int:
    """Largest legal channel block: a divisor of C_out that is either a multiple of the
    dtype sublane pack or the full C_out (full-extent blocks are always legal), and whose
    double-buffered in+out excite tiles fit in `avail_bytes`."""
    sub = _SUBLANE.get(itemsize, 8)
    per_row = 4 * _pad_to(lanes, 128) * itemsize        # 2 buffers x (in tile + out tile)
    legal = [d for d in range(1, c_out + 1) if c_out % d == 0 and d % sub == 0]
    if c_out not in legal:
        legal.append(c_out)                             # full extent: legal for any C_out
    fitting = [d for d in legal if d * per_row <= avail_bytes]
    return max(fitting) if fitting else min(legal)


# ------------------------------------------------------------------------------ kernel --

def _make_fused_kernel(n_batch: int, c_out: int, c_blk: int):
    def kernel(xsT_ref, w1_ref, b1_ref, w2_ref, b2_ref, xb_ref, out_ref, gate_ref):
        n_idx = pl.program_id(0)
        j_idx = pl.program_id(1)

        # ---- squeeze: recomputed once per batch row (j == 0).  Two MXU matmuls (pooling
        #      is pre-folded into w1), SiLU / sigmoid go to the EUP.  Redundant per-n
        #      recompute is negligible and is what lets the batch axis be "parallel". ----
        @pl.when(j_idx == 0)
        def _():
            hT = jnp.dot(w1_ref[...], xsT_ref[...],
                         preferred_element_type=jnp.float32) + b1_ref[...]     # [C_out, N]
            hT = jax.nn.silu(hT)
            mT = jnp.dot(w2_ref[...], hT,
                         preferred_element_type=jnp.float32) + b2_ref[...]     # [C_out, N]
            mT = jax.nn.sigmoid(mT)
            # Select this batch's column with a lane mask + reduction (no dynamic lane
            # slice, no transpose) and store the whole gate with a single write.
            lane = jax.lax.broadcasted_iota(jnp.int32, (c_out, n_batch), 1)
            sel = jnp.where(lane == n_idx, mT, 0.0)
            gate_ref[...] = jnp.sum(sel, axis=1, keepdims=True)                # [C_out, 1]

        # ---- excite: stream a (1, c_blk, lanes) tile of feat_big, scale by the gate ----
        c0 = pl.multiple_of(j_idx * c_blk, c_blk)
        g = gate_ref[pl.ds(c0, c_blk), :]                                      # [c_blk, 1]
        prod = xb_ref[...].astype(jnp.float32) * g[None, :, :]                 # f32 multiply
        out_ref[...] = prod.astype(out_ref.dtype)

    return kernel


# ----------------------------------------------------------------------------- wrapper --

def se_block_forward(feat_small, feat_big, w1, b1, w2, b2):
    # TODO(synk): the `c` (additional_input) conditional path of make_conv_block is not
    # implemented (its implementation is unspecified); spectral_norm is pure weight
    # preprocessing and is a no-op with these synthetic weights.
    N, C_in, Hs, Ws = feat_small.shape
    Nb, C_out, Hb, Wb = feat_big.shape
    assert Nb == N
    S = Hs * Ws
    lanes = Hb * Wb   # full-extent lane axis; multiple of 128 -> unmasked lane-dense stores

    # ---- weight / layout preprocessing (cheap XLA ops on tiny tensors) ----
    P = np.kron(_adaptive_pool_matrix(Hs), _adaptive_pool_matrix(Ws))          # [S, 16]
    # Fold the linear adaptive-avg-pool into conv1's weight:
    #   W1eff[o, c*S + s] = sum_k w1[o, c, k] * P[s, k]
    w1eff = jnp.einsum('ock,sk->ocs', w1.reshape(C_out, C_in, 16),
                       jnp.asarray(P)).reshape(C_out, C_in * S)                # [C_out, C_in*S]
    xsT = feat_small.reshape(N, C_in * S).T                                    # [C_in*S, N]
    b1c = b1.reshape(C_out, 1)
    w2m = w2[:, :, 0, 0]                                                       # [C_out, C_out]
    b2c = b2.reshape(C_out, 1)
    xb3 = feat_big.reshape(N, C_out, lanes)                                    # metadata-only

    # ---- generation-aware VMEM budgeting and tile-size choice ----
    itemsize = feat_big.dtype.itemsize
    budget = _vmem_budget_bytes()
    consts = [xsT, w1eff, b1c, w2m, b2c]
    const_bytes = sum(_padded_vmem_bytes(a.shape, a.dtype.itemsize) for a in consts)  # x1 (Buffered(1))
    gate_bytes = _padded_vmem_bytes((C_out, 1), 4)
    margin = 2 << 20
    avail = max(budget - const_bytes - gate_bytes - margin, 0)
    c_blk = _pick_channel_block(C_out, lanes, itemsize, avail)
    excite_bytes = 4 * c_blk * _pad_to(lanes, 128) * itemsize                  # 2 x (in + out)
    vmem_limit = int(max(budget, const_bytes + gate_bytes + excite_bytes + margin))

    grid = (N, C_out // c_blk)
    kernel = _make_fused_kernel(N, C_out, c_blk)

    def const_spec(arr):
        # Block index never changes -> fetched once; single-buffered to halve its footprint.
        zeros = (0,) * arr.ndim
        return pl.BlockSpec(arr.shape, lambda n, j, _z=zeros: _z,
                            pipeline_mode=pl.Buffered(1))

    cost = pl.CostEstimate(
        flops=int(N * (2 * C_out * C_in * S + 2 * C_out * C_out) + N * C_out * lanes),
        transcendentals=int(2 * N * N * C_out),
        bytes_accessed=int(2 * feat_big.size * itemsize + feat_small.size * 4
                           + w1eff.size * 4 + w2m.size * 4 + 2 * C_out * 4),
    )

    out3 = pl.pallas_call(
        kernel,
        out_shape=jax.ShapeDtypeStruct((N, C_out, lanes), feat_big.dtype),
        grid=grid,
        in_specs=[
            const_spec(xsT),                                      # feat_small, [C_in*S, N]
            const_spec(w1eff),                                    # pool-folded conv1 weight
            const_spec(b1c),
            const_spec(w2m),                                      # conv2 (1x1) weight
            const_spec(b2c),
            pl.BlockSpec((1, c_blk, lanes), lambda n, j: (n, j, 0)),   # feat_big tile
        ],
        out_specs=pl.BlockSpec((1, c_blk, lanes), lambda n, j: (n, j, 0)),
        scratch_shapes=[pltpu.VMEM((C_out, 1), jnp.float32)],     # per-batch gate
        compiler_params=pltpu.CompilerParams(
            # Batch axis is independent (gate recomputed per n at j==0) -> megacore-parallel
            # on v7x; channel-block axis must stay sequential (gate write at j==0, reads j>0).
            dimension_semantics=("parallel", "arbitrary"),
            vmem_limit_bytes=vmem_limit),
        cost_estimate=cost,
    )(xsT, w1eff, b1c, w2m, b2c, xb3)

    return out3.reshape(N, C_out, Hb, Wb)


# --------------------------------------------------------------------------- reference --

def se_block_reference(feat_small, feat_big, w1, b1, w2, b2):
    # Pure-JAX reference (Hs, Ws divisible by 4 here, so adaptive pool == mean pool).
    N, C_in, Hs, Ws = feat_small.shape
    pooled = feat_small.reshape(N, C_in, 4, Hs // 4, 4, Ws // 4).mean(axis=(3, 5))
    h = jnp.einsum('ncij,ocij->no', pooled, w1) + b1
    h = jax.nn.silu(h)
    m = jnp.einsum('nc,oc->no', h, w2[:, :, 0, 0]) + b2
    m = jax.nn.sigmoid(m)
    return feat_big * m[:, :, None, None]


if __name__ == "__main__":
    key = jax.random.PRNGKey(0)
    k1, k2, k3, k4, k5, k6 = jax.random.split(key, 6)

    N, C_in, C_out = 2, 4, 8
    Hs = Ws = 8     # feat_small spatial
    Hb = Wb = 16    # feat_big spatial

    feat_small = jax.random.normal(k1, (N, C_in, Hs, Ws), jnp.float32)
    feat_big = jax.random.normal(k2, (N, C_out, Hb, Wb), jnp.float32)

    # Deterministic synthetic parameters (Conv2d(C_in,C_out,4,bias=True),
    # Conv2d(C_out,C_out,1,bias=True)); spectral_norm only rescales weights.
    w1 = 0.1 * jax.random.normal(k3, (C_out, C_in, 4, 4), jnp.float32)
    b1 = 0.1 * jax.random.normal(k4, (C_out,), jnp.float32)
    w2 = 0.1 * jax.random.normal(k5, (C_out, C_out, 1, 1), jnp.float32)
    b2 = 0.1 * jax.random.normal(k6, (C_out,), jnp.float32)

    out = jax.jit(se_block_forward)(feat_small, feat_big, w1, b1, w2, b2)
    out = jax.block_until_ready(out)

    ref = se_block_reference(feat_small, feat_big, w1, b1, w2, b2)
    err = float(jnp.max(jnp.abs(out - ref)))
    assert jnp.allclose(out, ref, atol=1e-4, rtol=1e-4), f"max abs err = {err}"
    print("KERNEL_OK")
</pallas_src>

<mosaic_0001>
module attributes {stable_mosaic.version = 11 : i64} {
  func.func @kernel(%arg0: i32, %arg1: i32, %arg2: memref<256x2xf32, #tpu.memory_space<vmem>>, %arg3: memref<8x256xf32, #tpu.memory_space<vmem>>, %arg4: memref<8x1xf32, #tpu.memory_space<vmem>>, %arg5: memref<8x8xf32, #tpu.memory_space<vmem>>, %arg6: memref<8x1xf32, #tpu.memory_space<vmem>>, %arg7: memref<1x8x256xf32, #tpu.memory_space<vmem>>, %arg8: memref<1x8x256xf32, #tpu.memory_space<vmem>>, %arg9: memref<8x1xf32, #tpu.memory_space<vmem>>) attributes {dimension_semantics = [#tpu.dimension_semantics<parallel>, #tpu.dimension_semantics<arbitrary>], iteration_bounds = array<i64: 2, 1>, scalar_prefetch = 0 : i64, scratch_operands = 1 : i64, tpu.core_type = #tpu.core_type<tc>, window_params = [{pipeline_mode = #tpu.pipeline_mode<synchronous>, transform_indices = @transform_0, window_bounds = array<i64: 256, 2>}, {pipeline_mode = #tpu.pipeline_mode<synchronous>, transform_indices = @transform_1, window_bounds = array<i64: 8, 256>}, {pipeline_mode = #tpu.pipeline_mode<synchronous>, transform_indices = @transform_2, window_bounds = array<i64: 8, 1>}, {pipeline_mode = #tpu.pipeline_mode<synchronous>, transform_indices = @transform_3, window_bounds = array<i64: 8, 8>}, {pipeline_mode = #tpu.pipeline_mode<synchronous>, transform_indices = @transform_4, window_bounds = array<i64: 8, 1>}, {transform_indices = @transform_5, window_bounds = array<i64: 1, 8, 256>}, {transform_indices = @transform_6, window_bounds = array<i64: 1, 8, 256>}]} {
    %c0_i32 = arith.constant 0 : i32
    %0 = arith.cmpi eq, %arg1, %c0_i32 : i32
    %1 = arith.extui %0 : i1 to i32
    %c0_i32_0 = arith.constant 0 : i32
    %2 = arith.cmpi ne, %1, %c0_i32_0 : i32
    scf.if %2 {
      %c0_7 = arith.constant 0 : index
      %c0_8 = arith.constant 0 : index
      %12 = vector.load %arg3[%c0_7, %c0_8] : memref<8x256xf32, #tpu.memory_space<vmem>>, vector<8x256xf32>
      %c0_9 = arith.constant 0 : index
      %c0_10 = arith.constant 0 : index
      %13 = vector.load %arg2[%c0_9, %c0_10] : memref<256x2xf32, #tpu.memory_space<vmem>>, vector<256x2xf32>
      %cst = arith.constant dense<0.000000e+00> : vector<8x2xf32>
      %14 = tpu.matmul %12, %13, %cst {dimension_numbers = #tpu.dot_dimension_numbers<[1], [0], [0], [1], [0, 0, 1, 1], [], []>} : vector<8x256xf32>, vector<256x2xf32>, vector<8x2xf32> -> vector<8x2xf32>
      %c0_11 = arith.constant 0 : index
      %c0_12 = arith.constant 0 : index
      %15 = vector.load %arg4[%c0_11, %c0_12] : memref<8x1xf32, #tpu.memory_space<vmem>>, vector<8x1xf32>
      %16 = vector.broadcast %15 : vector<8x1xf32> to vector<8x2xf32>
      %17 = arith.addf %14, %16 : vector<8x2xf32>
      %18 = arith.negf %17 : vector<8x2xf32>
      %19 = math.exp %18 : vector<8x2xf32>
      %cst_13 = arith.constant 1.000000e+00 : f32
      %20 = vector.broadcast %cst_13 : f32 to vector<8x2xf32>
      %21 = arith.addf %20, %19 : vector<8x2xf32>
      %22 = arith.divf %20, %21 : vector<8x2xf32>
      %23 = arith.mulf %17, %22 : vector<8x2xf32>
      %c0_14 = arith.constant 0 : index
      %c0_15 = arith.constant 0 : index
      %24 = vector.load %arg5[%c0_14, %c0_15] : memref<8x8xf32, #tpu.memory_space<vmem>>, vector<8x8xf32>
      %cst_16 = arith.constant dense<0.000000e+00> : vector<8x2xf32>
      %25 = tpu.matmul %24, %23, %cst_16 {dimension_numbers = #tpu.dot_dimension_numbers<[1], [0], [0], [1], [0, 0, 1, 1], [], []>} : vector<8x8xf32>, vector<8x2xf32>, vector<8x2xf32> -> vector<8x2xf32>
      %c0_17 = arith.constant 0 : index
      %c0_18 = arith.constant 0 : index
      %26 = vector.load %arg6[%c0_17, %c0_18] : memref<8x1xf32, #tpu.memory_space<vmem>>, vector<8x1xf32>
      %27 = vector.broadcast %26 : vector<8x1xf32> to vector<8x2xf32>
      %28 = arith.addf %25, %27 : vector<8x2xf32>
      %29 = arith.negf %28 : vector<8x2xf32>
      %30 = math.exp %29 : vector<8x2xf32>
      %cst_19 = arith.constant 1.000000e+00 : f32
      %31 = vector.broadcast %cst_19 : f32 to vector<8x2xf32>
      %32 = arith.addf %31, %30 : vector<8x2xf32>
      %33 = arith.divf %31, %32 : vector<8x2xf32>
      %34 = tpu.iota {dimensions = array<i32: 1>} : vector<8x2xi32>
      %35 = vector.broadcast %arg0 : i32 to vector<8x2xi32>
      %36 = arith.cmpi eq, %34, %35 : vector<8x2xi32>
      %cst_20 = arith.constant 0.000000e+00 : f32
      %37 = vector.broadcast %cst_20 : f32 to vector<8x2xf32>
      %38 = arith.select %36, %33, %37 : vector<8x2xi1>, vector<8x2xf32>
      %cst_21 = arith.constant dense<0.000000e+00> : vector<8xf32>
      %39 = vector.multi_reduction <add>, %38, %cst_21 [1] : vector<8x2xf32> to vector<8xf32>
      %40 = vector.shape_cast %39 : vector<8xf32> to vector<8x1xf32>
      %c0_22 = arith.constant 0 : index
      %c0_23 = arith.constant 0 : index
      %41 = vector.load %arg9[%c0_22, %c0_23] : memref<8x1xf32, #tpu.memory_space<vmem>>, vector<8x1xf32>
      tpu.vector_store %arg9[%c0_22, %c0_23], %40 {strides = array<i32>} : memref<8x1xf32, #tpu.memory_space<vmem>>, vector<8x1xf32>,
    } else {
    }
    %c8_i32 = arith.constant 8 : i32
    %3 = arith.muli %arg1, %c8_i32 : i32
    %4 = tpu.assume_multiple %3, 8 : i32
    %5 = arith.index_cast %4 : i32 to index
    %c0 = arith.constant 0 : index
    %6 = vector.load %arg9[%5, %c0] : memref<8x1xf32, #tpu.memory_space<vmem>>, vector<8x1xf32>
    %c0_1 = arith.constant 0 : index
    %c0_2 = arith.constant 0 : index
    %c0_3 = arith.constant 0 : index
    %7 = vector.load %arg7[%c0_1, %c0_2, %c0_3] : memref<1x8x256xf32, #tpu.memory_space<vmem>>, vector<1x8x256xf32>
    %8 = vector.shape_cast %6 : vector<8x1xf32> to vector<1x8x1xf32>
    %9 = vector.broadcast %8 : vector<1x8x1xf32> to vector<1x8x256xf32>
    %10 = arith.mulf %7, %9 : vector<1x8x256xf32>
    %c0_4 = arith.constant 0 : index
    %c0_5 = arith.constant 0 : index
    %c0_6 = arith.constant 0 : index
    %11 = vector.load %arg8[%c0_4, %c0_5, %c0_6] : memref<1x8x256xf32, #tpu.memory_space<vmem>>, vector<1x8x256xf32>
    tpu.vector_store %arg8[%c0_4, %c0_5, %c0_6], %10 {strides = array<i32>} : memref<1x8x256xf32, #tpu.memory_space<vmem>>, vector<1x8x256xf32>,
    return
  }
  func.func @transform_0(%arg0: i32, %arg1: i32) -> (i32, i32) {
    %c0_i32 = arith.constant 0 : i32
    %c0_i32_0 = arith.constant 0 : i32
    %c0_i32_1 = arith.constant 0 : i32
    return %c0_i32, %c0_i32_0 : i32, i32
  }
  func.func @transform_1(%arg0: i32, %arg1: i32) -> (i32, i32) {
    %c0_i32 = arith.constant 0 : i32
    %c0_i32_0 = arith.constant 0 : i32
    %c0_i32_1 = arith.constant 0 : i32
    return %c0_i32, %c0_i32_0 : i32, i32
  }
  func.func @transform_2(%arg0: i32, %arg1: i32) -> (i32, i32) {
    %c0_i32 = arith.constant 0 : i32
    %c0_i32_0 = arith.constant 0 : i32
    %c0_i32_1 = arith.constant 0 : i32
    return %c0_i32, %c0_i32_0 : i32, i32
  }
  func.func @transform_3(%arg0: i32, %arg1: i32) -> (i32, i32) {
    %c0_i32 = arith.constant 0 : i32
    %c0_i32_0 = arith.constant 0 : i32
    %c0_i32_1 = arith.constant 0 : i32
    return %c0_i32, %c0_i32_0 : i32, i32
  }
  func.func @transform_4(%arg0: i32, %arg1: i32) -> (i32, i32) {
    %c0_i32 = arith.constant 0 : i32
    %c0_i32_0 = arith.constant 0 : i32
    %c0_i32_1 = arith.constant 0 : i32
    return %c0_i32, %c0_i32_0 : i32, i32
  }
  func.func @transform_5(%arg0: i32, %arg1: i32) -> (i32, i32, i32) {
    %c0_i32 = arith.constant 0 : i32
    %c0_i32_0 = arith.constant 0 : i32
    return %arg0, %arg1, %c0_i32 : i32, i32, i32
  }
  func.func @transform_6(%arg0: i32, %arg1: i32) -> (i32, i32, i32) {
    %c0_i32 = arith.constant 0 : i32
    %c0_i32_0 = arith.constant 0 : i32
    return %arg0, %arg1, %c0_i32 : i32, i32, i32
  }
}

</mosaic_0001>

<bundles_post_ra>
// kernel: se_block_forward.1
= control target key start
LH: loop header
LB: loop body
LE: loop exit
PB: predicated region body
PF: predicated region fallthrough
CT: control target
= control target key end

     0   :  { %s804_s21 = smov 0   ;;  %s806_s22 = smov 0   ;;  %s953_s0 = inlined_call_operand.vmem [shape: f32[256,2], index: 0, kind: input, shape index: {}]   ;;  %s954_s1 = inlined_call_operand.vmem [shape: f32[8,256], index: 1, kind: input, shape index: {}]   ;;  %s955_s2 = inlined_call_operand.vmem [shape: f32[8,1], index: 2, kind: input, shape index: {}]   ;;  %s956_s3 = inlined_call_operand.vmem [shape: f32[8,8], index: 3, kind: input, shape index: {}]   ;;  %s957_s4 = inlined_call_operand.vmem [shape: f32[8,1], index: 4, kind: input, shape index: {}]   ;;  %s958_s5 = inlined_call_operand.vmem [shape: f32[2,8,256], index: 5, kind: input, shape index: {}]   ;;  %s959_s6 = inlined_call_operand.vmem [shape: f32[2,8,256], index: 6, kind: output, shape index: {}]  }
   0x1   :  { %s808_s23 = smov 0  }
   0x2 LB: > { %s28_s24 = sadd.s32 1, %s760_s22  ;;  %p619_p0 = scmp.ge.s32.totalorder %s764_s23, 1  ;;  %s764_s23 = sphi %s808_s23, %s16_s23   ;;  %s760_s22 = sphi %s806_s22, %s961_s22   ;;  %s756_s21 = sphi %s804_s21, %s960_s21  }
   0x3   : > { %p30_p1 = scmp.ge.s32.totalorder %s28_s24, 2  ;;  %p232_p2 = scmp.lt.s32.totalorder %s764_s23, 3 }
   0x5   : > { %s963_s24 = smov (%p30_p1, %s28_s24), 0  ;;  %p233_p3 = pnand %p619_p0, %p232_p2 }
   0x6   : > { %v310_v0 = vld [vmem:[%s953_s0 + $0x80] sm:$0xff] (!%p233_p3)  ;;  %v311_v1 = vld [vmem:[%s953_s0 + $0x88] sm:$0xff] (!%p233_p3)  ;;  %v312_v5 = vld [vmem:[%s953_s0 + $0x90] sm:$0xff] (!%p233_p3)  ;;  %v766_v7 = vmov (!%p233_p3), 0   ;;  %v767_v53 = vmov (!%p233_p3), 0.0   ;;  %vm768_vm0 = vmmov (!%p233_p3), 0  }
   0x7   : > { %236 = sbr.rel (%p233_p3) target bundleno = 810 (0x32a), region = 44  ;;  %v294_v2 = vld [vmem:[%s953_s0] sm:$0xff] (!%p233_p3)  ;;  %v673_v3 = vpack.c.bf16 (!%p233_p3), %v311_v1, %v310_v0  ;;  %v295_v4 = vld [vmem:[%s953_s0 + $0x8] sm:$0xff] (!%p233_p3)  ;;  %v313_v6 = vld [vmem:[%s953_s0 + $0x98] sm:$0xff] (!%p233_p3)  ;;  %732 = vset.pattern.permute.xlu0 (!%p233_p3), %v766_v7  ;;  %733 = vset.pattern.permute.xlu1 (!%p233_p3), %v766_v7  ;;  %vm416_vm1 = vcmask (!%p233_p3), 64512   ;;  %vm501_vm3 = vcmask (!%p233_p3), 15360  }
   0x8   : > { %v675_v8 = vpack.c.bf16 (!%p233_p3), %v295_v4, %v294_v2  ;;  %v677_v9 = vpack.c.bf16 (!%p233_p3), %v313_v6, %v312_v5  ;;  %v296_v10 = vld [vmem:[%s953_s0 + $0x10] sm:$0xff] (!%p233_p3)  ;;  %v297_v11 = vld [vmem:[%s953_s0 + $0x18] sm:$0xff] (!%p233_p3)  ;;  %v314_v12 = vld [vmem:[%s953_s0 + $0xa0] sm:$0xff] (!%p233_p3)  ;;  %668 = vmatprep.subr.mxu1 (!%p233_p3), %v767_v53  ;;  %670 = vmatprep.mubr.msk.f32.mxu1 (!%p233_p3), %vm768_vm0, %v767_v53  ;;  %vm505_vm4 = vcmask (!%p233_p3), 7168   ;;  %p270_p4 = scmp.lt.s32.totalorder (!%p233_p3), %s756_s21, 1 }
   0x9   : > { %674 = vmatprep.subr.bf16.mxu0 (!%p233_p3), %v673_v3  ;;  %v315_v13 = vld [vmem:[%s953_s0 + $0xa8] sm:$0xff] (!%p233_p3)  ;;  %v679_v14 = vpack.c.bf16 (!%p233_p3), %v297_v11, %v296_v10  ;;  %v298_v16 = vld [vmem:[%s953_s0 + $0x20] sm:$0xff] (!%p233_p3)  ;;  %v316_v18 = vld [vmem:[%s953_s0 + $0xb0] sm:$0xff] (!%p233_p3)  ;;  %v498_v10 = vstv (!%p233_p3), %s756_s21 }
   0xa   : > { %676 = vmatpush3.bf16.msra.mxu0 (!%p233_p3), %v675_v8  ;;  %v681_v15 = vpack.c.bf16 (!%p233_p3), %v315_v13, %v314_v12  ;;  %v299_v17 = vld [vmem:[%s953_s0 + $0x28] sm:$0xff] (!%p233_p3)  ;;  %v317_v19 = vld [vmem:[%s953_s0 + $0xb8] sm:$0xff] (!%p233_p3)  ;;  %v300_v22 = vld [vmem:[%s953_s0 + $0x30] sm:$0xff] (!%p233_p3)  ;;  %v496_v8 = vlaneseq (!%p233_p3) }
   0xb   : > { %678 = vmatprep.subr.bf16.mxu0 (!%p233_p3), %v677_v9  ;;  %v683_v20 = vpack.c.bf16 (!%p233_p3), %v299_v17, %v298_v16  ;;  %v685_v21 = vpack.c.bf16 (!%p233_p3), %v317_v19, %v316_v18  ;;  %v301_v23 = vld [vmem:[%s953_s0 + $0x38] sm:$0xff] (!%p233_p3)  ;;  %v318_v24 = vld [vmem:[%s953_s0 + $0xc0] sm:$0xff] (!%p233_p3)  ;;  %v319_v25 = vld [vmem:[%s953_s0 + $0xc8] sm:$0xff] (!%p233_p3) }
   0xc   : > { %v293_v26 = vld [vmem:[%s954_s1 + $0x8] sm:$0xff] (!%p233_p3)  ;;  %v326_v27 = vld [vmem:[%s955_s2] sm:$0xff] (!%p233_p3)  ;;  %v687_v28 = vpack.c.bf16 (!%p233_p3), %v301_v23, %v300_v22  ;;  %v689_v29 = vpack.c.bf16 (!%p233_p3), %v319_v25, %v318_v24  ;;  %v320_v33 = vld [vmem:[%s953_s0 + $0xd0] sm:$0xff] (!%p233_p3)  ;;  %v497_v9 = vand.u32 (!%p233_p3), 127, %v496_v8 }
   0xd   : > { %396 = vmatprep.mubr.f32.mxu0 (!%p233_p3), %v293_v26  ;;  %329 = vperm.xlu0 (!%p233_p3), %732, %v326_v27   ;;  %v302_v30 = vld [vmem:[%s953_s0 + $0x40] sm:$0xff] (!%p233_p3)  ;;  %v303_v31 = vld [vmem:[%s953_s0 + $0x48] sm:$0xff] (!%p233_p3)  ;;  %v321_v34 = vld [vmem:[%s953_s0 + $0xd8] sm:$0xff] (!%p233_p3) }
   0xe   : > { %680 = vmatpush3.bf16.msra.mxu0 %v679_v14  ;;  %v410_v32 = vld [vmem:[%s957_s4] sm:$0xff]  ;;  %v691_v35 = vpack.c.bf16 %v303_v31, %v302_v30  ;;  %v693_v36 = vpack.c.bf16 %v321_v34, %v320_v33  ;;  %v304_v37 = vld [vmem:[%s953_s0 + $0x50] sm:$0xff]  ;;  %v305_v38 = vld [vmem:[%s953_s0 + $0x58] sm:$0xff]  ;;  %vm499_vm2 = vcmp.eq.s32.totalorder %v497_v9, %v498_v10  ;;  %s965_s21 = smov (!%p270_p4, %s756_s21), 1 }
   0xf   : > { %682 = vmatprep.subr.bf16.mxu0 %v681_v15  ;;  %v322_v39 = vld [vmem:[%s953_s0 + $0xe0] sm:$0xff]  ;;  %v323_v40 = vld [vmem:[%s953_s0 + $0xe8] sm:$0xff]  ;;  %v695_v41 = vpack.c.bf16 %v305_v38, %v304_v37  ;;  %v324_v45 = vld [vmem:[%s953_s0 + $0xf0] sm:$0xff]  ;;  %s629_s15 = sshll.u32 %s965_s21, 4 }
  0x10   : > { %v697_v42 = vpack.c.bf16 %v323_v40, %v322_v39  ;;  %v306_v43 = vld [vmem:[%s953_s0 + $0x60] sm:$0xff]  ;;  %v307_v44 = vld [vmem:[%s953_s0 + $0x68] sm:$0xff]  ;;  %v325_v46 = vld [vmem:[%s953_s0 + $0xf8] sm:$0xff]  ;;  %s278_s18 = scalar_lea.vmem %s958_s5, %s629_s15  ;;  %s287_s25 = scalar_lea.vmem %s959_s6, %s629_s15 }
  0x11   : > { %413 = vperm.xlu0 %732, %v410_v32   ;;  %v699_v47 = vpack.c.bf16 %v307_v44, %v306_v43  ;;  %v701_v48 = vpack.c.bf16 %v325_v46, %v324_v45  ;;  %v308_v49 = vld [vmem:[%s953_s0 + $0x70] sm:$0xff]  ;;  %v309_v50 = vld [vmem:[%s953_s0 + $0x78] sm:$0xff]  ;;  %v292_v52 = vld [vmem:[%s954_s1] sm:$0xff] }
  0x12   : > { %684 = vmatpush3.bf16.msra.mxu0 %v683_v20  ;;  %v703_v51 = vpack.c.bf16 %v309_v50, %v308_v49  ;;  %v409_v0 = vld [vmem:[%s956_s3] sm:$0xff]  ;;  %v511_v17 = vld [vmem:[%s278_s18 + $0x8] sm:$0xff] }
  0x13   : > { %686 = vmatprep.subr.bf16.mxu0 %v685_v21  ;;  %v510_v16 = vld [vmem:[%s278_s18] sm:$0xff] }
  0x16   : > { %688 = vmatpush3.bf16.msra.mxu0 %v687_v28 }
  0x17   : > { %690 = vmatprep.subr.bf16.mxu0 %v689_v29 }
  0x1a   : > { %692 = vmatpush3.bf16.msra.mxu0 %v691_v35 }
  0x1b   : > { %694 = vmatprep.subr.bf16.mxu0 %v693_v36 }
  0x1e   : > { %696 = vmatpush3.bf16.msra.mxu0 %v695_v41 }
  0x1f   : > { %698 = vmatprep.subr.bf16.mxu0 %v697_v42 }
  0x22   : > { %700 = vmatpush3.bf16.msra.mxu0 %v699_v47 }
  0x23   : > { %702 = vmatprep.subr.bf16.mxu0 %v701_v48 }
  0x26   : > { %704 = vmatpush3.bf16.msra.mxu0 %v703_v51 }
  0x29   : > { %397 = vmatmul.mubr.f32.vlgmr.msra.gmra.mrb[0].mxu0 %v292_v52 }
  0x8c   : > { %v330_v57 = vpop.permute.xlu0 %329 }
  0x90   : > { %v414_v1 = vpop.permute.xlu0 %413 }
  0xfc   : > { %v663_v54 = vpop.f32.mrb[0].mxu0 }
  0xfd   : > { %v664_v55 = vpop.f32.mrb[1].mxu0 }
  0xfe   : > { %v665_v56 = vadd.f32 %v664_v55, %v663_v54 }
 0x100   : > { %v399_v58 = vadd.f32 %v665_v56, %v330_v57 }
 0x102   : > { %v624_v59 = vmul.f32 -1.442695, %v399_v58 }
 0x104   : > { %734 = vpow2.f32 %v624_v59 }
 0x10e   : > { %v735_v60 = vpop.eup %734 }
 0x10f   : > { %v405_v61 = vadd.f32 1.0, %v735_v60 }
 0x111   : > { %736 = vrcp.f32 %v405_v61 }
 0x11b   : > { %v737_v62 = vpop.eup %736 }
 0x11c   : > { %v408_v63 = vmul.f32 %v737_v62, %v399_v58 }
 0x11e   : > { %669 = vmatpush3.msra.mxu1 %v408_v63 }
 0x11f   : > { %671 = vmatmul.mubr.msk.f32.vlgmr.msra.gmra.mrb[0].mxu1 %vm416_vm1, %v409_v0 }
 0x1f2   : > { %v486_v2 = vpop.f32.mrb[0].mxu1 }
 0x1f3   : > { %v487_v3 = vadd.f32 %v486_v2, %v414_v1  ;;  %v672_v4 = vpop.f32.mrb[1].mxu1 }
 0x1f5   : > { %v626_v5 = vmul.f32 -1.442695, %v487_v3 }
 0x1f7   : > { %738 = vpow2.f32 %v626_v5 }
 0x201   : > { %v739_v6 = vpop.eup %738 }
 0x202   : > { %v493_v7 = vadd.f32 1.0, %v739_v6 }
 0x204   : > { %740 = vrcp.f32 %v493_v7 }
 0x20e   : > { %v741_v11 = vpop.eup %740 }
 0x20f   : > { %v500_v12 = vsel %vm499_vm2, %v741_v11, 0.0 }
 0x210   : > { %v502_v13 = vsel %vm501_vm3, %v500_v12, 0.0 }
 0x211   : > { %503 = vadd.xlane.f32.xlu1 %v502_v13 }
 0x29e   : > { %v504_v14 = vpop.xlane.xlu1 %503 }
 0x29f   : > { %506 = vst.msk [vmem:[#allocation2] sm:$0xff] %vm505_vm4, %v504_v14 }
 0x2a6   : > { %v509_v15 = vld [vmem:[#allocation2] sm:$0xff] }
 0x2a7   : > { %514 = vperm.xlu1 %733, %v509_v15  }
 0x326   : > { %v515_v18 = vpop.permute.xlu1 %514 }
 0x327   : > { %v517_v19 = vmul.f32 %v515_v18, %v510_v16  ;;  %v518_v20 = vmul.f32 %v515_v18, %v511_v17 }
 0x329   : > { %519 = vst [vmem:[%s287_s25] sm:$0xff] %v517_v19  ;;  %520 = vst [vmem:[%s287_s25 + $0x8] sm:$0xff] %v518_v20 }
 0x32a PF: > { %s16_s23 = sadd.s32 1, %s764_s23   ;;  %s960_s21 = smov %s760_s22 }
 0x32b   : > { %p13_p5 = scmp.ge.s32.totalorder %s16_s23, 4   ;;  %s961_s22 = smov %s963_s24 }
 0x32d   :  { %15 = sbr.rel (!%p13_p5) target bundleno = 2 (0x2), region = 79 }

</bundles_post_ra>
